<compile_context>
chip_gen: v7x
topology: tpu7x:2x2x1
jax: 0.10.0
libtpu: 0.0.40
codegen_flags: <defaults>
</compile_context>

<pallas_src>
import jax
import jax.numpy as jnp
from jax import lax
from jax.experimental import pallas as pl
from jax.experimental.pallas import tpu as pltpu


def _dropout_partial_kernel(x_ref, drop_ref, segp_ref, segq_ref, o_ref):
    """Process one (T, H*W) row tile.

    x_ref    : (T, HW)  input slab (selected + untouched columns)
    drop_ref : (T, HW)  1.0 where a *selected* element is dropped, else 0.0
    segp_ref : (HW, H)  P[i, h] = 1 if i // W == h            (segment sum)
    segq_ref : (H, HW)  Q[h, j] = sel(j) / K if j // W == h   (redistribute)
    """
    xf = x_ref[...].astype(jnp.float32)
    d = xf * drop_ref[...].astype(jnp.float32)            # dropped mass / element
    # per-(row, h) dropped mass, summed and broadcast back via MXU
    seg_sum = jnp.dot(d, segp_ref[...],
                      precision=lax.Precision.HIGHEST,
                      preferred_element_type=jnp.float32)  # (T, H)
    redis = jnp.dot(seg_sum, segq_ref[...],
                    precision=lax.Precision.HIGHEST,
                    preferred_element_type=jnp.float32)    # (T, HW)
    # selected & dropped -> dropped_mass/K ; selected & kept -> x + dropped_mass/K
    # not selected       -> x exactly (d == 0 and redis == 0 there)
    o_ref[...] = (xf - d + redis).astype(o_ref.dtype)


def _choose_row_tile(rows, lane_dim, bytes_per_elem=4, per_buffer_budget=2 << 20):
    """Largest row tile (multiple of 8, divides `rows`) fitting ~2 MiB/buffer.

    Keeps double-buffered in/out tiles well under the scoped-VMEM default on
    v5e/v6e/v7x while staying >= a few hundred rows when the input allows it.
    """
    max_t = min(512, max(8, (per_buffer_budget // (lane_dim * bytes_per_elem)) // 8 * 8))
    t = max_t
    while t >= 8:
        if rows % t == 0:
            return t
        t -= 8
    return rows  # rows < 8 or not a multiple of 8: single full-rows block


def dropout_partial_binary(x, include_index, p, key, training=True):
    """JAX/Pallas forward of Dropout_partial_binary. x: [B, C, H, W] (NCHW)."""
    if not (0.0 <= p <= 1.0):
        raise ValueError(f"dropout probability has to be between 0 and 1, but got {p}")
    if not training:
        return x  # eval mode: identity

    B, C, H, W = x.shape
    idx = tuple(int(i) for i in include_index)  # assumed distinct (matches module intent)
    K = len(idx)
    HW = H * W
    rows = B * C
    dtype = x.dtype

    # Column-selection mask over the flattened H*W axis (sel(j) = (j % W) in idx).
    sel_w = jnp.zeros((W,), jnp.bool_).at[jnp.asarray(idx, jnp.int32)].set(True)
    col_w = jnp.arange(HW, dtype=jnp.int32) % W
    sel_hw = sel_w[col_w]                                                 # (HW,)

    # Drop decision, generated with jax.random and pre-masked to selected columns.
    drop = jax.random.bernoulli(key, p, (rows, HW)) & sel_hw[None, :]
    drop_f = drop.astype(dtype)

    # Constant segment matrices for the MXU-based "sum per W-segment, broadcast /K".
    # TODO(synk): for very large H*W feature maps replace these (size ~HW*H) with an
    # in-kernel reshape/reduce to bound their VMEM footprint.
    seg_id = jnp.arange(HW, dtype=jnp.int32) // W                         # (HW,)
    h_id = jnp.arange(H, dtype=jnp.int32)                                 # (H,)
    seg_p = (seg_id[:, None] == h_id[None, :]).astype(jnp.float32)        # (HW, H)
    seg_q = ((h_id[:, None] == seg_id[None, :]) & sel_hw[None, :]).astype(jnp.float32) / K  # (H, HW)

    x2 = x.reshape(rows, HW)                                              # free reshape
    row_tile = _choose_row_tile(rows, HW, bytes_per_elem=x2.dtype.itemsize)
    grid = (rows // row_tile,)

    out2 = pl.pallas_call(
        _dropout_partial_kernel,
        out_shape=jax.ShapeDtypeStruct((rows, HW), dtype),
        grid=grid,
        in_specs=[
            pl.BlockSpec((row_tile, HW), lambda i: (i, 0)),   # x tile
            pl.BlockSpec((row_tile, HW), lambda i: (i, 0)),   # drop-mask tile
            pl.BlockSpec((HW, H), lambda i: (0, 0)),          # P (resident, fetched once)
            pl.BlockSpec((H, HW), lambda i: (0, 0)),          # Q (resident, fetched once)
        ],
        out_specs=pl.BlockSpec((row_tile, HW), lambda i: (i, 0)),
        compiler_params=pltpu.CompilerParams(
            dimension_semantics=("parallel",)),               # rows are independent (v7x 2-TC)
    )(x2, drop_f, seg_p, seg_q)

    return out2.reshape(B, C, H, W)


if __name__ == "__main__":
    root = jax.random.PRNGKey(0)
    kx, kd = jax.random.split(root)

    B, C, H, W = 2, 4, 16, 16
    include_index = [1, 3, 5, 7, 9, 11, 13, 15]   # K = 8 columns of W
    p = 0.5

    x = jax.random.normal(kx, (B, C, H, W), dtype=jnp.float32)

    y = dropout_partial_binary(x, include_index, p, kd, training=True)
    y = jax.block_until_ready(y)

    # sanity: untouched columns unchanged; selected-column row sums preserved
    excl = [i for i in range(W) if i not in include_index]
    assert jnp.allclose(y[:, :, :, excl], x[:, :, :, excl]), "non-selected columns changed"
    idx = jnp.asarray(include_index)
    assert jnp.allclose(
        jnp.sum(y[:, :, :, idx], axis=-1),
        jnp.sum(x[:, :, :, idx], axis=-1),
        atol=2e-3,
    ), "selected-column mass not preserved"

    # eval mode is identity
    y_eval = dropout_partial_binary(x, include_index, p, kd, training=False)
    assert jnp.array_equal(y_eval, x)

    print("KERNEL_OK")
</pallas_src>

<mosaic_0001>
module attributes {stable_mosaic.version = 11 : i64} {
  func.func @_dropout_partial_kernel(%arg0: i32, %arg1: memref<8x256xf32, #tpu.memory_space<vmem>>, %arg2: memref<8x256xf32, #tpu.memory_space<vmem>>, %arg3: memref<256x16xf32, #tpu.memory_space<vmem>>, %arg4: memref<16x256xf32, #tpu.memory_space<vmem>>, %arg5: memref<8x256xf32, #tpu.memory_space<vmem>>) attributes {dimension_semantics = [#tpu.dimension_semantics<parallel>], iteration_bounds = array<i64: 1>, scalar_prefetch = 0 : i64, scratch_operands = 0 : i64, tpu.core_type = #tpu.core_type<tc>, window_params = [{transform_indices = @transform_0, window_bounds = array<i64: 8, 256>}, {transform_indices = @transform_1, window_bounds = array<i64: 8, 256>}, {pipeline_mode = #tpu.pipeline_mode<synchronous>, transform_indices = @transform_2, window_bounds = array<i64: 256, 16>}, {pipeline_mode = #tpu.pipeline_mode<synchronous>, transform_indices = @transform_3, window_bounds = array<i64: 16, 256>}, {transform_indices = @transform_4, window_bounds = array<i64: 8, 256>}]} {
    %c0 = arith.constant 0 : index
    %c0_0 = arith.constant 0 : index
    %0 = vector.load %arg1[%c0, %c0_0] : memref<8x256xf32, #tpu.memory_space<vmem>>, vector<8x256xf32>
    %c0_1 = arith.constant 0 : index
    %c0_2 = arith.constant 0 : index
    %1 = vector.load %arg2[%c0_1, %c0_2] : memref<8x256xf32, #tpu.memory_space<vmem>>, vector<8x256xf32>
    %2 = arith.mulf %0, %1 : vector<8x256xf32>
    %c0_3 = arith.constant 0 : index
    %c0_4 = arith.constant 0 : index
    %3 = vector.load %arg3[%c0_3, %c0_4] : memref<256x16xf32, #tpu.memory_space<vmem>>, vector<256x16xf32>
    %cst = arith.constant dense<0.000000e+00> : vector<8x16xf32>
    %4 = tpu.matmul %2, %3, %cst {dimension_numbers = #tpu.dot_dimension_numbers<[1], [0], [0], [1], [0, 0, 1, 1], [], []>, precision = #tpu.contract_precision<fp32>} : vector<8x256xf32>, vector<256x16xf32>, vector<8x16xf32> -> vector<8x16xf32>
    %c0_5 = arith.constant 0 : index
    %c0_6 = arith.constant 0 : index
    %5 = vector.load %arg4[%c0_5, %c0_6] : memref<16x256xf32, #tpu.memory_space<vmem>>, vector<16x256xf32>
    %cst_7 = arith.constant dense<0.000000e+00> : vector<8x256xf32>
    %6 = tpu.matmul %4, %5, %cst_7 {dimension_numbers = #tpu.dot_dimension_numbers<[1], [0], [0], [1], [0, 0, 1, 1], [], []>, precision = #tpu.contract_precision<fp32>} : vector<8x16xf32>, vector<16x256xf32>, vector<8x256xf32> -> vector<8x256xf32>
    %7 = arith.subf %0, %2 : vector<8x256xf32>
    %8 = arith.addf %7, %6 : vector<8x256xf32>
    %c0_8 = arith.constant 0 : index
    %c0_9 = arith.constant 0 : index
    %9 = vector.load %arg5[%c0_8, %c0_9] : memref<8x256xf32, #tpu.memory_space<vmem>>, vector<8x256xf32>
    tpu.vector_store %arg5[%c0_8, %c0_9], %8 {strides = array<i32>} : memref<8x256xf32, #tpu.memory_space<vmem>>, vector<8x256xf32>,
    return
  }
  func.func @transform_0(%arg0: i32) -> (i32, i32) {
    %c0_i32 = arith.constant 0 : i32
    %c0_i32_0 = arith.constant 0 : i32
    return %arg0, %c0_i32 : i32, i32
  }
  func.func @transform_1(%arg0: i32) -> (i32, i32) {
    %c0_i32 = arith.constant 0 : i32
    %c0_i32_0 = arith.constant 0 : i32
    return %arg0, %c0_i32 : i32, i32
  }
  func.func @transform_2(%arg0: i32) -> (i32, i32) {
    %c0_i32 = arith.constant 0 : i32
    %c0_i32_0 = arith.constant 0 : i32
    %c0_i32_1 = arith.constant 0 : i32
    return %c0_i32, %c0_i32_0 : i32, i32
  }
  func.func @transform_3(%arg0: i32) -> (i32, i32) {
    %c0_i32 = arith.constant 0 : i32
    %c0_i32_0 = arith.constant 0 : i32
    %c0_i32_1 = arith.constant 0 : i32
    return %c0_i32, %c0_i32_0 : i32, i32
  }
  func.func @transform_4(%arg0: i32) -> (i32, i32) {
    %c0_i32 = arith.constant 0 : i32
    %c0_i32_0 = arith.constant 0 : i32
    return %arg0, %c0_i32 : i32, i32
  }
}

</mosaic_0001>

<bundles_post_ra>
// kernel: tpu_custom_call.1
= control target key start
LH: loop header
LB: loop body
LE: loop exit
PB: predicated region body
PF: predicated region fallthrough
CT: control target
= control target key end

     0   :  { %s2509_s0 = inlined_call_operand.vmem [shape: f32[8,256], index: 0, kind: input, shape index: {}]   ;;  %s2510_s1 = inlined_call_operand.vmem [shape: f32[8,256], index: 1, kind: input, shape index: {}]   ;;  %s2511_s2 = inlined_call_operand.vmem [shape: f32[256,16], index: 2, kind: input, shape index: {}]   ;;  %s2512_s3 = inlined_call_operand.vmem [shape: f32[16,256], index: 3, kind: input, shape index: {}]   ;;  %s2513_s4 = inlined_call_operand.hbm [shape: f32[8,256], index: 4, kind: output, shape index: {}]  }
   0x1   :  { %v40_v0 = vld [vmem:[%s2511_s2 + $0x80] sm:$0xff]  ;;  %v41_v1 = vld [vmem:[%s2511_s2 + $0x88] sm:$0xff]  ;;  %v42_v7 = vld [vmem:[%s2511_s2 + $0x90] sm:$0xff] }
   0x2   :  { %v24_v2 = vld [vmem:[%s2511_s2] sm:$0xff]  ;;  %v105_v3 = vand.u32 4294901760, %v40_v0  ;;  %v108_v4 = vand.u32 4294901760, %v41_v1  ;;  %v25_v5 = vld [vmem:[%s2511_s2 + $0x8] sm:$0xff]  ;;  %v43_v8 = vld [vmem:[%s2511_s2 + $0x98] sm:$0xff]  ;;  %v111_v10 = vand.u32 4294901760, %v42_v7 }
   0x3   :  { %v57_v6 = vand.u32 4294901760, %v24_v2  ;;  %v60_v9 = vand.u32 4294901760, %v25_v5  ;;  %v114_v11 = vand.u32 4294901760, %v43_v8  ;;  %v26_v12 = vld [vmem:[%s2511_s2 + $0x10] sm:$0xff]  ;;  %v27_v13 = vld [vmem:[%s2511_s2 + $0x18] sm:$0xff]  ;;  %v44_v18 = vld [vmem:[%s2511_s2 + $0xa0] sm:$0xff] }
   0x4   :  { %v1950_v14 = vpack.c.bf16 %v108_v4, %v105_v3  ;;  %v63_v16 = vand.u32 4294901760, %v26_v12  ;;  %v66_v17 = vand.u32 4294901760, %v27_v13  ;;  %v45_v19 = vld [vmem:[%s2511_s2 + $0xa8] sm:$0xff]  ;;  %v28_v23 = vld [vmem:[%s2511_s2 + $0x20] sm:$0xff]  ;;  %v1973_v25 = vsub.f32 %v42_v7, %v111_v10  ;;  %v46_v37 = vld [vmem:[%s2511_s2 + $0xb0] sm:$0xff] }
   0x5   :  { %v1952_v15 = vsub.f32 %v24_v2, %v57_v6  ;;  %v1960_v20 = vpack.c.bf16 %v60_v9, %v57_v6  ;;  %v1962_v21 = vsub.f32 %v25_v5, %v60_v9  ;;  %v1964_v22 = vpack.c.bf16 %v114_v11, %v111_v10  ;;  %v29_v24 = vld [vmem:[%s2511_s2 + $0x28] sm:$0xff]  ;;  %v47_v42 = vld [vmem:[%s2511_s2 + $0xb8] sm:$0xff]  ;;  %v30_v55 = vld [vmem:[%s2511_s2 + $0x30] sm:$0xff] }
   0x6   :  { %1648 = vmatprep.subr.bf16.mxu0 %v1950_v14  ;;  %v1975_v26 = vsub.f32 %v43_v8, %v114_v11  ;;  %v1977_v27 = vpack.c.bf16 %v66_v17, %v63_v16  ;;  %v1979_v28 = vsub.f32 %v26_v12, %v63_v16  ;;  %v117_v29 = vand.u32 4294901760, %v44_v18  ;;  %v31_v56 = vld [vmem:[%s2511_s2 + $0x38] sm:$0xff] }
   0x7   :  { %1650 = vmatpush3.bf16.msra.mxu0 %v1960_v20  ;;  %v120_v30 = vand.u32 4294901760, %v45_v19  ;;  %v1982_v31 = vsub.f32 %v40_v0, %v105_v3  ;;  %v1984_v32 = vsub.f32 %v41_v1, %v108_v4  ;;  %v69_v33 = vand.u32 4294901760, %v28_v23 }
   0x8   :  { %1652 = vmatprep.subr.bf16.mxu0 %v1964_v22  ;;  %v72_v34 = vand.u32 4294901760, %v29_v24  ;;  %v2530_v35 = vand.u32 4294901760, %v1952_v15  ;;  %v2529_v36 = vand.u32 4294901760, %v1962_v21  ;;  %v1992_v38 = vsub.f32 %v27_v13, %v66_v17 }
   0x9   :  { %v1994_v39 = vpack.c.bf16 %v120_v30, %v117_v29  ;;  %v1996_v40 = vsub.f32 %v44_v18, %v117_v29  ;;  %v2535_v41 = vand.u32 4294901760, %v1982_v31  ;;  %v2002_v43 = vsub.f32 %v45_v19, %v120_v30 }
   0xa   :  { %v2532_v44 = vand.u32 4294901760, %v1984_v32  ;;  %v2005_v45 = vpack.c.bf16 %v72_v34, %v69_v33  ;;  %v2007_v46 = vsub.f32 %v28_v23, %v69_v33  ;;  %v172_v48 = vsub.f32 %v1952_v15, %v2530_v35 }
   0xb   :  { %1654 = vmatpush3.bf16.msra.mxu0 %v1977_v27  ;;  %v284_v47 = vsub.f32 %v1982_v31, %v2535_v41  ;;  %v179_v49 = vsub.f32 %v1962_v21, %v2529_v36  ;;  %v123_v50 = vand.u32 4294901760, %v46_v37  ;;  %v126_v52 = vand.u32 4294901760, %v47_v42 }
   0xc   :  { %1656 = vmatprep.subr.bf16.mxu0 %v1994_v39  ;;  %v291_v51 = vsub.f32 %v1984_v32, %v2532_v44  ;;  %v2527_v53 = vand.u32 4294901760, %v1973_v25  ;;  %v2526_v54 = vand.u32 4294901760, %v1975_v26  ;;  %v2031_v58 = vsub.f32 %v29_v24, %v72_v34 }
   0xd   :  { %v285_v57 = vand.u32 4294901760, %v284_v47  ;;  %v173_v59 = vand.u32 4294901760, %v172_v48  ;;  %v180_v60 = vand.u32 4294901760, %v179_v49 }
   0xe   :  { %9 = vsyncpa [#allocation3], 0  ;;  %v292_v61 = vand.u32 4294901760, %v291_v51  ;;  %v2033_v62 = vpack.c.bf16 %v126_v52, %v123_v50  ;;  %v2035_v63 = vsub.f32 %v46_v37, %v123_v50  ;;  %v298_v0 = vsub.f32 %v1973_v25, %v2527_v53  ;;  %v48_v5 = vld [vmem:[%s2511_s2 + $0xc0] sm:$0xff]  ;;  %v49_v6 = vld [vmem:[%s2511_s2 + $0xc8] sm:$0xff] }
   0xf   :  { %1658 = vmatpush3.bf16.msra.mxu0 %v2005_v45  ;;  %v1681_v1 = vpack.c.bf16 %v180_v60, %v173_v59  ;;  %v305_v2 = vsub.f32 %v1975_v26, %v2526_v54  ;;  %v75_v3 = vand.u32 4294901760, %v30_v55  ;;  %v78_v4 = vand.u32 4294901760, %v31_v56  ;;  %v32_v11 = vld [vmem:[%s2511_s2 + $0x40] sm:$0xff]  ;;  %v33_v29 = vld [vmem:[%s2511_s2 + $0x48] sm:$0xff] }
  0x10   :  { %v1679_v7 = vpack.c.bf16 %v292_v61, %v285_v57  ;;  %1660 = vmatprep.subr.bf16.mxu0 %v2033_v62  ;;  %v299_v8 = vand.u32 4294901760, %v298_v0  ;;  %v2525_v9 = vand.u32 4294901760, %v1979_v28  ;;  %v2522_v10 = vand.u32 4294901760, %v1992_v38  ;;  %v51_v57 = vld [vmem:[%s2511_s2 + $0xd8] sm:$0xff] }
  0x11   :  { %v2056_v12 = vsub.f32 %v47_v42, %v126_v52  ;;  %v306_v13 = vand.u32 4294901760, %v305_v2  ;;  %v2058_v16 = vpack.c.bf16 %v78_v4, %v75_v3  ;;  %v2060_v17 = vsub.f32 %v30_v55, %v75_v3 }
  0x12   :  { %1680 = vmatprep.subr.bf16.mxu1 %v1679_v7  ;;  %v186_v18 = vsub.f32 %v1979_v28, %v2525_v9  ;;  %v193_v19 = vsub.f32 %v1992_v38, %v2522_v10  ;;  %v129_v23 = vand.u32 4294901760, %v48_v5  ;;  %v132_v24 = vand.u32 4294901760, %v49_v6 }
  0x13   :  { %1682 = vmatpush3.bf16.msra.mxu1 %v1681_v1  ;;  %v1683_v30 = vpack.c.bf16 %v306_v13, %v299_v8  ;;  %1662 = vmatpush3.bf16.msra.mxu0 %v2058_v16  ;;  %v2520_v33 = vand.u32 4294901760, %v1996_v40  ;;  %v2519_v34 = vand.u32 4294901760, %v2002_v43  ;;  %v81_v37 = vand.u32 4294901760, %v32_v11  ;;  %v34_v1 = vld [vmem:[%s2511_s2 + $0x50] sm:$0xff] }
  0x14   :  { %v2074_v42 = vsub.f32 %v31_v56, %v78_v4  ;;  %v187_v47 = vand.u32 4294901760, %v186_v18  ;;  %v194_v48 = vand.u32 4294901760, %v193_v19  ;;  %v2076_v49 = vpack.c.bf16 %v132_v24, %v129_v23  ;;  %v50_v56 = vld [vmem:[%s2511_s2 + $0xd0] sm:$0xff]  ;;  %v35_v18 = vld [vmem:[%s2511_s2 + $0x58] sm:$0xff] }
  0x15   :  { %1684 = vmatprep.subr.bf16.mxu1 %v1683_v30  ;;  %v2078_v50 = vsub.f32 %v48_v5, %v129_v23  ;;  %v312_v51 = vsub.f32 %v1996_v40, %v2520_v33  ;;  %v319_v52 = vsub.f32 %v2002_v43, %v2519_v34  ;;  %v84_v55 = vand.u32 4294901760, %v33_v29 }
  0x16   :  { %v1685_v59 = vpack.c.bf16 %v194_v48, %v187_v47  ;;  %1664 = vmatprep.subr.bf16.mxu0 %v2076_v49  ;;  %v2093_v60 = vsub.f32 %v49_v6, %v132_v24  ;;  %v2517_v61 = vand.u32 4294901760, %v2007_v46  ;;  %v2516_v0 = vand.u32 4294901760, %v2031_v58 }
  0x17   :  { %v313_v2 = vand.u32 4294901760, %v312_v51  ;;  %v320_v3 = vand.u32 4294901760, %v319_v52  ;;  %v2100_v4 = vpack.c.bf16 %v84_v55, %v81_v37  ;;  %v2102_v5 = vsub.f32 %v32_v11, %v81_v37 }
  0x18   :  { %1686 = vmatpush3.bf16.msra.mxu1 %v1685_v59  ;;  %v200_v6 = vsub.f32 %v2007_v46, %v2517_v61  ;;  %v207_v7 = vsub.f32 %v2031_v58, %v2516_v0  ;;  %v135_v8 = vand.u32 4294901760, %v50_v56  ;;  %v138_v13 = vand.u32 4294901760, %v51_v57 }
  0x19   :  { %v1687_v19 = vpack.c.bf16 %v320_v3, %v313_v2  ;;  %1666 = vmatpush3.bf16.msra.mxu0 %v2100_v4  ;;  %v2515_v11 = vand.u32 4294901760, %v2035_v63  ;;  %v2514_v23 = vand.u32 4294901760, %v2056_v12  ;;  %v87_v24 = vand.u32 4294901760, %v34_v1 }
  0x1a   :  { %v2116_v30 = vsub.f32 %v33_v29, %v84_v55  ;;  %v201_v37 = vand.u32 4294901760, %v200_v6  ;;  %v208_v47 = vand.u32 4294901760, %v207_v7  ;;  %v2118_v48 = vpack.c.bf16 %v138_v13, %v135_v8  ;;  %v52_v29 = vld [vmem:[%s2511_s2 + $0xe0] sm:$0xff]  ;;  %v53_v55 = vld [vmem:[%s2511_s2 + $0xe8] sm:$0xff] }
  0x1b   :  { %1688 = vmatprep.subr.bf16.mxu1 %v1687_v19  ;;  %v2120_v51 = vsub.f32 %v50_v56, %v135_v8  ;;  %v326_v52 = vsub.f32 %v2035_v63, %v2515_v11  ;;  %v333_v59 = vsub.f32 %v2056_v12, %v2514_v23  ;;  %v90_v2 = vand.u32 4294901760, %v35_v18  ;;  %v36_v8 = vld [vmem:[%s2511_s2 + $0x60] sm:$0xff] }
  0x1c   :  { %v1689_v3 = vpack.c.bf16 %v208_v47, %v201_v37  ;;  %1668 = vmatprep.subr.bf16.mxu0 %v2118_v48  ;;  %v2135_v56 = vsub.f32 %v51_v57, %v138_v13  ;;  %v2518_v6 = vand.u32 4294901760, %v2060_v17  ;;  %v2521_v7 = vand.u32 4294901760, %v2074_v42 }
  0x1d   :  { %v327_v19 = vand.u32 4294901760, %v326_v52  ;;  %v334_v23 = vand.u32 4294901760, %v333_v59  ;;  %v2142_v11 = vpack.c.bf16 %v90_v2, %v87_v24  ;;  %v2144_v0 = vsub.f32 %v34_v1, %v87_v24  ;;  %v37_v52 = vld [vmem:[%s2511_s2 + $0x68] sm:$0xff] }
  0x1e   :  { %1690 = vmatpush3.bf16.msra.mxu1 %v1689_v3  ;;  %v214_v57 = vsub.f32 %v2060_v17, %v2518_v6  ;;  %v221_v13 = vsub.f32 %v2074_v42, %v2521_v7  ;;  %v141_v37 = vand.u32 4294901760, %v52_v29  ;;  %v144_v47 = vand.u32 4294901760, %v53_v55 }
  0x1f   :  { %2561 = vst [vmem:[#allocation5_spill] sm:$0xff] %v2142_v11  ;;  %v1691_v59 = vpack.c.bf16 %v334_v23, %v327_v19  ;;  %1670 = vmatpush3.bf16.msra.mxu0 %v2142_v11  ;;  %v2524_v1 = vand.u32 4294901760, %v2078_v50  ;;  %v2523_v24 = vand.u32 4294901760, %v2093_v60  ;;  %v93_v3 = vand.u32 4294901760, %v36_v8 }
  0x20   :  { %v2158_v61 = vsub.f32 %v35_v18, %v90_v2  ;;  %v215_v6 = vand.u32 4294901760, %v214_v57  ;;  %v222_v34 = vand.u32 4294901760, %v221_v13  ;;  %v2160_v33 = vpack.c.bf16 %v144_v47, %v141_v37  ;;  %v54_v18 = vld [vmem:[%s2511_s2 + $0xf0] sm:$0xff]  ;;  %v55_v2 = vld [vmem:[%s2511_s2 + $0xf8] sm:$0xff] }
  0x21   :  { %1692 = vmatprep.subr.bf16.mxu1 %v1691_v59  ;;  %v2162_v7 = vsub.f32 %v52_v29, %v141_v37  ;;  %v340_v23 = vsub.f32 %v2078_v50, %v2524_v1  ;;  %v347_v19 = vsub.f32 %v2093_v60, %v2523_v24  ;;  %v96_v10 = vand.u32 4294901760, %v37_v52  ;;  %v38_v59 = vld [vmem:[%s2511_s2 + $0x70] sm:$0xff] }
  0x22   :  { %2562 = vst [vmem:[#allocation6_spill] sm:$0xff] %v2160_v33  ;;  %v1693_v57 = vpack.c.bf16 %v222_v34, %v215_v6  ;;  %1672 = vmatprep.subr.bf16.mxu0 %v2160_v33  ;;  %v2177_v29 = vsub.f32 %v53_v55, %v144_v47  ;;  %v2528_v13 = vand.u32 4294901760, %v2102_v5  ;;  %v2531_v37 = vand.u32 4294901760, %v2116_v30 }
  0x23   :  { %v341_v24 = vand.u32 4294901760, %v340_v23  ;;  %v348_v1 = vand.u32 4294901760, %v347_v19  ;;  %v2184_v9 = vpack.c.bf16 %v96_v10, %v93_v3  ;;  %v2186_v54 = vsub.f32 %v36_v8, %v93_v3  ;;  %v39_v23 = vld [vmem:[%s2511_s2 + $0x78] sm:$0xff] }
  0x24   :  { %1694 = vmatpush3.bf16.msra.mxu1 %v1693_v57  ;;  %v228_v34 = vsub.f32 %v2102_v5, %v2528_v13  ;;  %v235_v55 = vsub.f32 %v2116_v30, %v2531_v37  ;;  %v147_v6 = vand.u32 4294901760, %v54_v18  ;;  %v150_v47 = vand.u32 4294901760, %v55_v2 }
  0x25   :  { %2563 = vst [vmem:[#allocation7_spill] sm:$0xff] %v2184_v9  ;;  %v1695_v19 = vpack.c.bf16 %v348_v1, %v341_v24  ;;  %1674 = vmatpush3.bf16.msra.mxu0 %v2184_v9  ;;  %v2534_v8 = vand.u32 4294901760, %v2120_v51  ;;  %v2533_v3 = vand.u32 4294901760, %v2135_v56  ;;  %v99_v57 = vand.u32 4294901760, %v38_v59 }
  0x26   :  { %v2200_v53 = vsub.f32 %v37_v52, %v96_v10  ;;  %v229_v13 = vand.u32 4294901760, %v228_v34  ;;  %v236_v36 = vand.u32 4294901760, %v235_v55  ;;  %v2202_v35 = vpack.c.bf16 %v150_v47, %v147_v6  ;;  %v2215_v10 = vld [vmem:[%s2509_s0 + $0x8] sm:$0xff] }
  0x27   :  { %1696 = vmatprep.subr.bf16.mxu1 %v1695_v19  ;;  %v2204_v37 = vsub.f32 %v54_v18, %v147_v6  ;;  %v354_v1 = vsub.f32 %v2120_v51, %v2534_v8  ;;  %v361_v24 = vsub.f32 %v2135_v56, %v2533_v3  ;;  %v102_v44 = vand.u32 4294901760, %v39_v23  ;;  %2565 = vst [vmem:[#allocation9_spill] sm:$0xff] %v2215_v10  ;;  %v21_v52 = vld [vmem:[%s2510_s1 + $0x8] sm:$0xff]  ;;  %v2228_v19 = vld [vmem:[%s2509_s0] sm:$0xff] }
  0x28   :  { %2564 = vst [vmem:[#allocation8_spill] sm:$0xff] %v2202_v35  ;;  %v1697_v18 = vpack.c.bf16 %v236_v36, %v229_v13  ;;  %1676 = vmatprep.subr.bf16.mxu0 %v2202_v35  ;;  %v2221_v34 = vsub.f32 %v55_v2, %v150_v47  ;;  %v2540_v55 = vand.u32 4294901760, %v2144_v0  ;;  %v2541_v6 = vand.u32 4294901760, %v2158_v61  ;;  %2566 = vst [vmem:[#allocation10_spill] sm:$0xff] %v2228_v19  ;;  %v20_v3 = vld [vmem:[%s2510_s1] sm:$0xff] }
  0x29   :  { %v355_v8 = vand.u32 4294901760, %v354_v1  ;;  %v362_v41 = vand.u32 4294901760, %v361_v24  ;;  %v2233_v36 = vpack.c.bf16 %v102_v44, %v99_v57  ;;  %v2235_v13 = vsub.f32 %v38_v59, %v99_v57 }
  0x2a   :  { %1698 = vmatpush3.bf16.msra.mxu1 %v1697_v18  ;;  %v242_v2 = vsub.f32 %v2144_v0, %v2540_v55  ;;  %v249_v47 = vsub.f32 %v2158_v61, %v2541_v6  ;;  %v2244_v35 = vmul.f32 %v21_v52, %v2215_v10  ;;  %v2544_v9 = vand.u32 4294901760, %v2162_v7 }
  0x2b   :  { %2567 = vst [vmem:[#allocation11_spill] sm:$0xff] %v2233_v36  ;;  %v1699_v1 = vpack.c.bf16 %v362_v41, %v355_v8  ;;  %1678 = vmatpush3.bf16.msra.mxu0 %v2233_v36  ;;  %v2545_v59 = vand.u32 4294901760, %v2177_v29  ;;  %v1711_v57 = vpack.c.bf16 %v1984_v32, %v1982_v31  ;;  %v2252_v24 = vmul.f32 %v20_v3, %v2228_v19 }
  0x2c   :  { %2568 = vst [vmem:[#allocation12_spill] sm:$0xff] %v2244_v35  ;;  %v243_v18 = vand.u32 4294901760, %v242_v2  ;;  %v250_v55 = vand.u32 4294901760, %v249_v47  ;;  %v2255_v6 = vand.u32 4294901760, %v2244_v35  ;;  %v368_v52 = vsub.f32 %v2162_v7, %v2544_v9 }
  0x2d   :  { %2569 = vst [vmem:[#allocation13_spill] sm:$0xff] %v2252_v24  ;;  %1700 = vmatprep.subr.bf16.mxu1 %v1699_v1  ;;  %v375_v41 = vsub.f32 %v2177_v29, %v2545_v59  ;;  %1712 = vmatprep.subr.bf16.mxu0 %v1711_v57  ;;  %v2264_v8 = vand.u32 4294901760, %v2252_v24  ;;  %v2550_v3 = vand.u32 4294901760, %v2186_v54  ;;  %v2551_v2 = vand.u32 4294901760, %v2200_v53 }
  0x2e   :  { %2570 = vst [vmem:[#allocation14_spill] sm:$0xff] %v2255_v6  ;;  %v2268_v47 = vsub.f32 %v39_v23, %v102_v44  ;;  %v1701_v10 = vpack.c.bf16 %v250_v55, %v243_v18  ;;  %v2272_v19 = vsub.f32 %v2244_v35, %v2255_v6  ;;  %v369_v1 = vand.u32 4294901760, %v368_v52  ;;  %393 = vmatprep.mubr.f32.mxu1 %v2255_v6 }
  0x2f   :  { %v376_v9 = vand.u32 4294901760, %v375_v41  ;;  %v2277_v57 = vsub.f32 %v2252_v24, %v2264_v8  ;;  %v256_v59 = vsub.f32 %v2186_v54, %v2550_v3  ;;  %v263_v44 = vsub.f32 %v2200_v53, %v2551_v2 }
  0x30   :  { %1702 = vmatpush3.bf16.msra.mxu1 %v1701_v10  ;;  %v154_v23 = vand.u32 4294901760, %v2272_v19  ;;  %v2556_v55 = vand.u32 4294901760, %v2204_v37  ;;  %v2557_v18 = vand.u32 4294901760, %v2221_v34  ;;  %v269_v2 = vand.u32 4294901760, %v2235_v13 }
  0x31   :  { %v1703_v52 = vpack.c.bf16 %v376_v9, %v369_v1  ;;  %v2560_v41 = vand.u32 4294901760, %v2277_v57  ;;  %v257_v35 = vand.u32 4294901760, %v256_v59  ;;  %v264_v24 = vand.u32 4294901760, %v263_v44 }
  0x32   :  { %v155_v36 = vsub.f32 %v2272_v19, %v154_v23  ;;  %v382_v3 = vsub.f32 %v2204_v37, %v2556_v55  ;;  %v389_v10 = vsub.f32 %v2221_v34, %v2557_v18  ;;  %v1713_v59 = vpack.c.bf16 %v1962_v21, %v1952_v15 }
  0x33   :  { %1704 = vmatprep.subr.bf16.mxu1 %v1703_v52  ;;  %v161_v9 = vsub.f32 %v2277_v57, %v2560_v41  ;;  %v1705_v1 = vpack.c.bf16 %v264_v24, %v257_v35  ;;  %v276_v44 = vand.u32 4294901760, %v2268_v47  ;;  %v270_v18 = vsub.f32 %v2235_v13, %v269_v2 }
  0x34   :  { %v156_v6 = vand.u32 4294901760, %v155_v36  ;;  %v383_v33 = vand.u32 4294901760, %v382_v3  ;;  %v390_v55 = vand.u32 4294901760, %v389_v10  ;;  %v1715_v52 = vpack.c.bf16 %v1975_v26, %v1973_v25 }
  0x35   :  { %v162_v11 = vand.u32 4294901760, %v161_v9  ;;  %1706 = vmatpush3.bf16.msra.mxu1 %v1705_v1  ;;  %v277_v35 = vsub.f32 %v2268_v47, %v276_v44  ;;  %v271_v41 = vand.u32 4294901760, %v270_v18  ;;  %v1717_v3 = vpack.c.bf16 %v1992_v38, %v1979_v28 }
  0x36   :  { %157 = vmatprep.mubr.f32.mxu0 %v156_v6  ;;  %v1707_v24 = vpack.c.bf16 %v390_v55, %v383_v33  ;;  %v1719_v9 = vpack.c.bf16 %v2002_v43, %v1996_v40  ;;  %v1721_v1 = vpack.c.bf16 %v2031_v58, %v2007_v46  ;;  %v2571_v33 = vand.u32 4294901760, %v1982_v31 }
  0x37   :  { %163 = vmatmul.mubr.f32.vlgmr.msra.gmra.mrb[0].mxu0 %v162_v11  ;;  %v278_v36 = vand.u32 4294901760, %v277_v35  ;;  %v2572_v11 = vand.u32 4294901760, %v1984_v32  ;;  %v2573_v55 = vand.u32 4294901760, %v1952_v15  ;;  %v2574_v18 = vand.u32 4294901760, %v1962_v21 }
  0x38   :  { %1714 = vmatpush3.bf16.msra.mxu0 %v1713_v59  ;;  %1708 = vmatprep.subr.bf16.mxu1 %v1707_v24  ;;  %v2577_v24 = vand.u32 4294901760, %v1979_v28  ;;  %v2579_v31 = vand.u32 4294901760, %v1996_v40  ;;  %v2580_v32 = vand.u32 4294901760, %v2002_v43  ;;  %v2581_v15 = vand.u32 4294901760, %v2007_v46 }
  0x39   :  { %1716 = vmatprep.subr.bf16.mxu0 %v1715_v52  ;;  %v1709_v10 = vpack.c.bf16 %v278_v36, %v271_v41  ;;  %530 = vmatprep.mubr.f32.mxu0 %v2272_v19  ;;  %v1775_v6 = vpack.c.bf16 %v2572_v11, %v2571_v33  ;;  %v1777_v59 = vpack.c.bf16 %v2574_v18, %v2573_v55  ;;  %v2575_v41 = vand.u32 4294901760, %v1973_v25 }
  0x3a   :  { %v2576_v52 = vand.u32 4294901760, %v1975_v26  ;;  %v2578_v36 = vand.u32 4294901760, %v1992_v38  ;;  %v1783_v33 = vpack.c.bf16 %v2580_v32, %v2579_v31  ;;  %v2582_v21 = vand.u32 4294901760, %v2031_v58 }
  0x3b   :  { %1710 = vmatpush3.bf16.msra.mxu1 %v1709_v10  ;;  %v2583_v25 = vand.u32 4294901760, %v2035_v63  ;;  %v2584_v26 = vand.u32 4294901760, %v2056_v12  ;;  %v2585_v28 = vand.u32 4294901760, %v2060_v17  ;;  %v2586_v38 = vand.u32 4294901760, %v2074_v42 }
  0x3c   :  { %v1779_v35 = vpack.c.bf16 %v2576_v52, %v2575_v41  ;;  %v1781_v19 = vpack.c.bf16 %v2578_v36, %v2577_v24  ;;  %v1785_v11 = vpack.c.bf16 %v2582_v21, %v2581_v15  ;;  %1718 = vmatpush3.bf16.msra.mxu0 %v1717_v3  ;;  %1744 = vmatprep.subr.bf16.mxu1 %v1950_v14  ;;  %v2587_v40 = vand.u32 4294901760, %v2078_v50 }
  0x3d   :  { %v1787_v55 = vpack.c.bf16 %v2584_v26, %v2583_v25  ;;  %v1789_v10 = vpack.c.bf16 %v2586_v38, %v2585_v28  ;;  %v2588_v43 = vand.u32 4294901760, %v2093_v60  ;;  %v2589_v58 = vand.u32 4294901760, %v2102_v5  ;;  %1720 = vmatprep.subr.bf16.mxu0 %v1719_v9 }
  0x3e   :  { %v2590_v18 = vand.u32 4294901760, %v2116_v30  ;;  %v2591_v52 = vand.u32 4294901760, %v2120_v51  ;;  %v2592_v24 = vand.u32 4294901760, %v2135_v56  ;;  %v1723_v3 = vpack.c.bf16 %v2056_v12, %v2035_v63  ;;  %395 = vmatmul.mubr.f32.vlgmr.msra.gmra.mrb[0].mxu1 %v2264_v8 }
  0x3f   :  { %v1791_v46 = vpack.c.bf16 %v2588_v43, %v2587_v40  ;;  %v2593_v31 = vand.u32 4294901760, %v2144_v0  ;;  %v2594_v32 = vand.u32 4294901760, %v2158_v61  ;;  %v2595_v21 = vand.u32 4294901760, %v2186_v54  ;;  %1746 = vmatpush3.bf16.msra.mxu1 %v1960_v20  ;;  %637 = vmatprep.mubr.f32.mxu1 %v154_v23 }
  0x40   :  { %v1793_v41 = vpack.c.bf16 %v2590_v18, %v2589_v58  ;;  %v1795_v36 = vpack.c.bf16 %v2592_v24, %v2591_v52  ;;  %v2596_v25 = vand.u32 4294901760, %v2200_v53  ;;  %1722 = vmatpush3.bf16.msra.mxu0 %v1721_v1  ;;  %1748 = vmatprep.subr.bf16.mxu1 %v1964_v22  ;;  %v1725_v63 = vpack.c.bf16 %v2074_v42, %v2060_v17 }
  0x41   :  { %v1797_v15 = vpack.c.bf16 %v2594_v32, %v2593_v31  ;;  %1724 = vmatprep.subr.bf16.mxu0 %v1723_v3  ;;  %v1727_v12 = vpack.c.bf16 %v2093_v60, %v2078_v50  ;;  %v1729_v9 = vpack.c.bf16 %v2116_v30, %v2102_v5  ;;  %v1731_v23 = vpack.c.bf16 %v2135_v56, %v2120_v51  ;;  %v2598_v5 = vld [vmem:[#allocation6_spill] sm:$0xff]  ;;  %v2602_v51 = vld [vmem:[#allocation11_spill] sm:$0xff] }
  0x42   :  { %v2373_v26 = vpack.c.bf16 %v2596_v25, %v2595_v21  ;;  %v1733_v17 = vpack.c.bf16 %v2158_v61, %v2144_v0  ;;  %v1735_v42 = vpack.c.bf16 %v2177_v29, %v2162_v7  ;;  %v1737_v50 = vpack.c.bf16 %v2200_v53, %v2186_v54  ;;  %v2597_v0 = vld [vmem:[#allocation5_spill] sm:$0xff]  ;;  %v2599_v53 = vld [vmem:[#allocation7_spill] sm:$0xff]  ;;  %v2600_v54 = vld [vmem:[#allocation8_spill] sm:$0xff] }
  0x43   :  { %1750 = vmatpush3.bf16.msra.mxu1 %v1977_v27  ;;  %v1739_v60 = vpack.c.bf16 %v2221_v34, %v2204_v37  ;;  %v1741_v61 = vpack.c.bf16 %v2268_v47, %v2235_v13  ;;  %v2601_v30 = vld [vmem:[#allocation14_spill] sm:$0xff]  ;;  %v2603_v56 = vand.u32 4294901760, %v2277_v57  ;;  %v1899_v1 = vmov 0.0  }
  0x44   :  { %1726 = vmatpush3.bf16.msra.mxu0 %v1725_v63  ;;  %1752 = vmatprep.subr.bf16.mxu1 %v1994_v39  ;;  %vm922_vm0 = vcmask 130048  }
  0x45   :  { %1728 = vmatprep.subr.bf16.mxu0 %v1727_v12 }
  0x47   :  { %1754 = vmatpush3.bf16.msra.mxu1 %v2005_v45 }
  0x48   :  { %1730 = vmatpush3.bf16.msra.mxu0 %v1729_v9  ;;  %1756 = vmatprep.subr.bf16.mxu1 %v2033_v62 }
  0x49   :  { %1732 = vmatprep.subr.bf16.mxu0 %v1731_v23 }
  0x4b   :  { %1758 = vmatpush3.bf16.msra.mxu1 %v2058_v16 }
  0x4c   :  { %1734 = vmatpush3.bf16.msra.mxu0 %v1733_v17  ;;  %1760 = vmatprep.subr.bf16.mxu1 %v2076_v49 }
  0x4d   :  { %1736 = vmatprep.subr.bf16.mxu0 %v1735_v42 }
  0x4f   :  { %1762 = vmatpush3.bf16.msra.mxu1 %v2100_v4 }
  0x50   :  { %1738 = vmatpush3.bf16.msra.mxu0 %v1737_v50  ;;  %1764 = vmatprep.subr.bf16.mxu1 %v2118_v48 }
  0x51   :  { %1740 = vmatprep.subr.bf16.mxu0 %v1739_v60 }
  0x53   :  { %1766 = vmatpush3.bf16.msra.mxu1 %v2597_v0 }
  0x54   :  { %1742 = vmatpush3.bf16.msra.mxu0 %v1741_v61  ;;  %1768 = vmatprep.subr.bf16.mxu1 %v2598_v5 }
  0x55   :  { %1776 = vmatprep.subr.bf16.mxu0 %v1775_v6 }
  0x57   :  { %533 = vmatmul.mubr.f32.vlgmr.msra.gmra.mrb[2].mxu0 %v2277_v57  ;;  %1770 = vmatpush3.bf16.msra.mxu1 %v2599_v53 }
  0x58   :  { %1778 = vmatpush3.bf16.msra.mxu0 %v1777_v59  ;;  %1772 = vmatprep.subr.bf16.mxu1 %v2600_v54 }
  0x59   :  { %1780 = vmatprep.subr.bf16.mxu0 %v1779_v35  ;;  %807 = vmatprep.mubr.f32.mxu0 %v2601_v30 }
  0x5b   :  { %1774 = vmatpush3.bf16.msra.mxu1 %v2602_v51 }
  0x5c   :  { %1782 = vmatpush3.bf16.msra.mxu0 %v1781_v19  ;;  %1808 = vmatprep.subr.bf16.mxu1 %v1950_v14  ;;  %v2604_v14 = vand.u32 4294901760, %v2162_v7  ;;  %v920_v7 = vld [vmem:[%s2512_s3 + $0x10] sm:$0xff] }
  0x5d   :  { %1784 = vmatprep.subr.bf16.mxu0 %v1783_v33 }
  0x5e   :  { %641 = vmatmul.mubr.f32.vlgmr.msra.gmra.mrb[2].mxu1 %v2603_v56 }
  0x5f   :  { %1810 = vmatpush3.bf16.msra.mxu1 %v1960_v20  ;;  %911 = vmatprep.mubr.f32.mxu1 %v2601_v30  ;;  %v2605_v20 = vand.u32 4294901760, %v2177_v29 }
  0x60   :  { %1786 = vmatpush3.bf16.msra.mxu0 %v1785_v11  ;;  %1812 = vmatprep.subr.bf16.mxu1 %v1964_v22  ;;  %v2606_v22 = vand.u32 4294901760, %v2204_v37  ;;  %v932_v37 = vand.u32 4294901760, %v920_v7 }
  0x61   :  { %1788 = vmatprep.subr.bf16.mxu0 %v1787_v55  ;;  %v1799_v57 = vpack.c.bf16 %v2605_v20, %v2604_v14 }
  0x63   :  { %1814 = vmatpush3.bf16.msra.mxu1 %v1977_v27  ;;  %v2607_v27 = vand.u32 4294901760, %v2221_v34 }
  0x64   :  { %1790 = vmatpush3.bf16.msra.mxu0 %v1789_v10  ;;  %1816 = vmatprep.subr.bf16.mxu1 %v1994_v39 }
  0x65   :  { %1792 = vmatprep.subr.bf16.mxu0 %v1791_v46  ;;  %v1803_v39 = vpack.c.bf16 %v2607_v27, %v2606_v22 }
  0x67   :  { %1818 = vmatpush3.bf16.msra.mxu1 %v2005_v45  ;;  %v1805_v45 = vpack.c.bf16 %v276_v44, %v269_v2  ;;  %v2468_v44 = vsub.f32 %v920_v7, %v932_v37  ;;  %v2611_v7 = vld [vmem:[#allocation9_spill] sm:$0xff] }
  0x68   :  { %1794 = vmatpush3.bf16.msra.mxu0 %v1793_v41  ;;  %1820 = vmatprep.subr.bf16.mxu1 %v2033_v62  ;;  %v919_v62 = vld [vmem:[%s2512_s3 + $0x8] sm:$0xff] }
  0x69   :  { %1796 = vmatprep.subr.bf16.mxu0 %v1795_v36  ;;  %v1026_v55 = vand.u32 4294901760, %v2468_v44 }
  0x6b   :  { %1822 = vmatpush3.bf16.msra.mxu1 %v2058_v16  ;;  %v921_v16 = vld [vmem:[%s2512_s3 + $0x18] sm:$0xff]  ;;  %v1027_v40 = vsub.f32 %v2468_v44, %v1026_v55 }
  0x6c   :  { %1798 = vmatpush3.bf16.msra.mxu0 %v1797_v15  ;;  %1824 = vmatprep.subr.bf16.mxu1 %v2076_v49  ;;  %v926_v49 = vand.u32 4294901760, %v919_v62 }
  0x6d   :  { %1800 = vmatprep.subr.bf16.mxu0 %v1799_v57  ;;  %v1028_v18 = vand.u32 4294901760, %v1027_v40 }
  0x6e   :  { %v2459_v13 = vsub.f32 %v919_v62, %v926_v49  ;;  %v2608_v62 = vld [vmem:[#allocation13_spill] sm:$0xff] }
  0x6f   :  { %1826 = vmatpush3.bf16.msra.mxu1 %v2100_v4  ;;  %v930_v4 = vand.u32 4294901760, %v921_v16 }
  0x70   :  { %1802 = vmatpush3.bf16.msra.mxu0 %v2373_v26  ;;  %1828 = vmatprep.subr.bf16.mxu1 %v2118_v48  ;;  %v918_v48 = vld [vmem:[%s2512_s3] sm:$0xff]  ;;  %v1008_v6 = vand.u32 4294901760, %v2459_v13  ;;  %s1900_s3 = smov [#allocation2]  }
  0x71   :  { %1804 = vmatprep.subr.bf16.mxu0 %v1803_v39  ;;  %v928_v29 = vand.u32 4294901760, %v918_v48  ;;  %v2457_v34 = vpack.c.bf16 %v930_v4, %v926_v49  ;;  %s1429_s14 = sshll.u32 %s1900_s3, 4  ;;  %s1430_s14 = int_to_ptr.vmem [resolvable:$true] %s1429_s14 }
  0x72   :  { %v1009_v35 = vsub.f32 %v2459_v13, %v1008_v6  ;;  %s1875_s15 = scalar_lea.vmem %s1430_s14, 256  ;;  %p1880_p1 = scmp.lt.s32.totalorder %s1430_s14, %s1430_s14 }
  0x73   :  { %1830 = vmatpush3.bf16.msra.mxu1 %v2597_v0  ;;  %v2463_v2 = vpack.c.bf16 %v932_v37, %v928_v29  ;;  %v2465_v47 = vsub.f32 %v918_v48, %v928_v29  ;;  %v2610_v48 = vld [vmem:[#allocation12_spill] sm:$0xff]  ;;  %p1876_p0 = scmp.ne.s32.totalorder %s1430_s14, %s1875_s15  ;;  %p1881_p2 = scmp.lt.s32.totalorder %s1875_s15, %s1875_s15 }
  0x74   :  { %1806 = vmatpush3.bf16.msra.mxu0 %v1805_v45  ;;  %1832 = vmatprep.subr.bf16.mxu1 %v2598_v5  ;;  %v1010_v28 = vand.u32 4294901760, %v1009_v35  ;;  %v1418_v29 = vsub.f32 %v2611_v7, %v2610_v48 }
  0x75   :  { %1852 = vmatprep.subr.bf16.mxu0 %v2457_v34  ;;  %v1014_v11 = vand.u32 4294901760, %v2465_v47  ;;  %v1849_v24 = vpack.c.bf16 %v2468_v44, %v2465_v47  ;;  %p1882_p3 = por %p1881_p2, %p1880_p1 }
  0x77   :  { %809 = vmatmul.mubr.f32.vlgmr.msra.gmra.mrb[4].mxu0 %v2264_v8  ;;  %1834 = vmatpush3.bf16.msra.mxu1 %v2599_v53  ;;  %v1015_v10 = vsub.f32 %v2465_v47, %v1014_v11  ;;  %v1857_v43 = vpack.c.bf16 %v1026_v55, %v1014_v11  ;;  %p1883_p4 = pnand %p1882_p3, %p1876_p0 }
  0x78   :  { %1836 = vmatprep.subr.bf16.mxu1 %v2600_v54  ;;  %1854 = vmatpush1.bf16.msra.mxu0 %v2463_v2 }
  0x79   :  { %1247 = vmatprep.mubr.f32.mxu0 %v1899_v1  ;;  %v1016_v58 = vand.u32 4294901760, %v1015_v10 }
  0x7b   :  { %1838 = vmatpush3.bf16.msra.mxu1 %v2602_v51  ;;  %v1845_v52 = vpack.c.bf16 %v1028_v18, %v1016_v58 }
  0x7c   :  { %1840 = vmatprep.subr.bf16.mxu1 %v2457_v34 }
  0x7e   :  { %913 = vmatmul.mubr.f32.vlgmr.msra.gmra.mrb[4].mxu1 %v2264_v8  ;;  %v2461_v8 = vsub.f32 %v921_v16, %v930_v4  ;;  %v2609_v16 = vld [vmem:[#allocation10_spill] sm:$0xff] }
  0x7f   :  { %1842 = vmatpush1.bf16.msra.mxu1 %v2463_v2  ;;  %994 = vmatprep.mubr.f32.mxu1 %v1899_v1  ;;  %v1417_v49 = vsub.f32 %v2609_v16, %v2608_v62 }
  0x80   :  { %v1020_v59 = vand.u32 4294901760, %v2461_v8  ;;  %v1847_v41 = vpack.c.bf16 %v2461_v8, %v2459_v13 }
  0x82   :  { %v1021_v19 = vsub.f32 %v2461_v8, %v1020_v59  ;;  %v1855_v33 = vpack.c.bf16 %v1020_v59, %v1008_v6 }
  0x84   :  { %v1022_v38 = vand.u32 4294901760, %v1021_v19  ;;  %1856 = vmatprep.subr.bf16.mxu0 %v1855_v33 }
  0x86   :  { %v1843_v46 = vpack.c.bf16 %v1022_v38, %v1010_v28 }
  0x88   :  { %1844 = vmatprep.subr.bf16.mxu1 %v1843_v46 }
 0x10a   :  { %v1469_v36 = vpop.f32.mrb[0].mxu0 }
 0x10b   :  { %v1470_v3 = vpop.f32.mrb[1].mxu0 }
 0x10c   :  { %v1471_v31 = vadd.f32 %v1470_v3, %v1469_v36 }
 0x111   :  { %v1504_v32 = vpop.f32.mrb[0].mxu1 }
 0x112   :  { %v1505_v15 = vpop.f32.mrb[1].mxu1 }
 0x113   :  { %v1506_v21 = vadd.f32 %v1505_v15, %v1504_v32 }
 0x115   :  { %v397_v25 = vadd.f32 %v1506_v21, %v1471_v31 }
 0x12a   :  { %v1539_v26 = vpop.f32.mrb[2].mxu0 }
 0x12b   :  { %v1540_v63 = vpop.f32.mrb[3].mxu0 }
 0x12c   :  { %v1541_v12 = vadd.f32 %v1540_v63, %v1539_v26 }
 0x12e   :  { %v535_v9 = vadd.f32 %v1541_v12, %v397_v25 }
 0x131   :  { %v1574_v23 = vpop.f32.mrb[2].mxu1 }
 0x132   :  { %v1575_v17 = vpop.f32.mrb[3].mxu1 }
 0x133   :  { %v1576_v42 = vadd.f32 %v1575_v17, %v1574_v23 }
 0x135   :  { %v643_v50 = vadd.f32 %v1576_v42, %v535_v9 }
 0x14a   :  { %v1609_v60 = vpop.f32.mrb[4].mxu0 }
 0x14b   :  { %v1610_v61 = vpop.f32.mrb[5].mxu0 }
 0x14c   :  { %v1611_v0 = vadd.f32 %v1610_v61, %v1609_v60 }
 0x14e   :  { %v811_v5 = vadd.f32 %v1611_v0, %v643_v50 }
 0x151   :  { %v1644_v53 = vpop.f32.mrb[4].mxu1 }
 0x152   :  { %v1645_v54 = vpop.f32.mrb[5].mxu1 }
 0x153   :  { %v1646_v30 = vadd.f32 %v1645_v54, %v1644_v53 }
 0x155   :  { %v915_v51 = vadd.f32 %v1646_v30, %v811_v5 }
 0x157   :  { %v924_v56 = vsel %vm922_vm0, %v915_v51, 0 }
 0x158   :  { %v995_v14 = vand.u32 4294901760, %v924_v56 }
 0x15a   :  { %v996_v20 = vsub.f32 %v924_v56, %v995_v14 }
 0x15c   :  { %v997_v57 = vand.u32 4294901760, %v996_v20 }
 0x15e   :  { %1251 = vmatmul.mubr.f32.vlgmr.msra.gmra.mrb[6].mxu0 %v997_v57  ;;  %v998_v22 = vsub.f32 %v996_v20, %v997_v57 }
 0x15f   :  { %1858 = vmatpush1.bf16.msra.mxu0 %v1857_v43  ;;  %1333 = vmatprep.mubr.f32.mxu0 %v1899_v1 }
 0x160   :  { %v999_v27 = vand.u32 4294901760, %v998_v22  ;;  %1860 = vmatprep.subr.bf16.mxu0 %v2457_v34 }
 0x162   :  { %1000 = vmatmul.mubr.f32.vlgmr.msra.gmra.mrb[6].mxu1 %v999_v27 }
 0x163   :  { %1846 = vmatpush1.bf16.msra.mxu1 %v1845_v52  ;;  %1090 = vmatprep.mubr.f32.mxu1 %v1899_v1 }
 0x164   :  { %1848 = vmatprep.subr.bf16.mxu1 %v1847_v41 }
 0x166   :  { %1335 = vmatmul.mubr.f32.vlgmr.msra.gmra.mrb[6].mxu0 %v995_v14 }
 0x167   :  { %1862 = vmatpush1.bf16.msra.mxu0 %v2463_v2  ;;  %1409 = vmatprep.mubr.f32.mxu0 %v1899_v1 }
 0x16a   :  { %1092 = vmatmul.mubr.f32.vlgmr.msra.gmra.mrb[6].mxu1 %v995_v14 }
 0x16b   :  { %1850 = vmatpush1.bf16.msra.mxu1 %v1849_v24  ;;  %1170 = vmatprep.mubr.f32.mxu1 %v1899_v1 }
 0x16e   :  { %1411 = vmatmul.mubr.f32.vlgmr.msra.gmra.mrb[6].mxu0 %v995_v14 }
 0x172   :  { %1173 = vmatmul.mubr.f32.vlgmr.msra.gmra.mrb[6].mxu1 %v996_v20 }
 0x241   :  { %v1412_v39 = vpop.f32.mrb[6].mxu0 }
 0x242   :  { %v1414_v45 = vpop.f32.mrb[7].mxu0 }
 0x245   :  { %v1174_v4 = vpop.f32.mrb[6].mxu1 }
 0x246   :  { %v1863_v37 = vadd.f32 %v1412_v39, %v1174_v4  ;;  %v1176_v34 = vpop.f32.mrb[7].mxu1 }
 0x247   :  { %v1864_v13 = vadd.f32 %v1414_v45, %v1176_v34 }
 0x248   :  { %v1419_v8 = vadd.f32 %v1863_v37, %v1417_v49 }
 0x249   :  { %v1420_v2 = vadd.f32 %v1864_v13, %v1418_v29 }
 0x24a   :  { %1421 = vst [vmem:[#allocation2] sm:$0xff] %v1419_v8 }
 0x24b   :  { %1422 = vst [vmem:[#allocation2 + $0x8] sm:$0xff] %v1420_v2 }
 0x24c   :  { %1886 = shalt.err (!%p1883_p4)
}
 0x24d   :  { %s1887_s18 = scalar_lea.hbm %s2513_s4, 256 }
 0x24e   :  { %p1888_p5 = scmp.ne.s32.totalorder %s2513_s4, %s1887_s18  ;;  %p1891_p6 = scmp.lt.u32.totalorder %s1887_s18, %s2513_s4 }
 0x250   :  { %p1893_p7 = pnand %p1891_p6, %p1888_p5 }
 0x252   :  { %1896 = shalt.err (!%p1893_p7)
}
 0x253   :  { %1432 = dma.vmem_to_hbm [thread:$0]  %s1430_s14, 256, %s2513_s4, [#allocation3]  }
 0x254   :  { %1897 = dma.done.wait [#allocation3], 256  }
 0x255   :  { %1898 = vsyncadd [#allocation3], 4294967040 }
 0x256   :  { %1436 = vsyncpa [#allocation3], 1 }

</bundles_post_ra>
